<compile_context>
chip_gen: v5e
topology: v5e:2x2
jax: 0.10.0
libtpu: 0.0.40
codegen_flags: <defaults>
</compile_context>

<pallas_src>
import functools

import jax
import jax.numpy as jnp
from jax import lax
from jax.experimental import pallas as pl
from jax.experimental.pallas import tpu as pltpu


def _actor_kernel(scal_ref, attr_ref, edges_ref, r_ref, w_ref,
                  x_ref, feat_ref, feat_prob_ref, *, n_valid, n_pad):
    inv_t = scal_ref[0]          # 1 / T
    e = scal_ref[1]              # e

    # Binarize adjacency directly into the x output block (reuses its VMEM,
    # so raw + binarized (N, N) matrices are never both live).
    x_ref[...] = (edges_ref[...] > 0.0).astype(jnp.float32)

    attrs = attr_ref[...]                                            # (Np, Dp)
    agg = jnp.dot(x_ref[...], attrs,
                  preferred_element_type=jnp.float32)                # (Np, Dp)

    # Fold the two (N, 1) column parameters before broadcasting to (N, D).
    r = r_ref[...] + 1e-08                                           # (Np, 1)
    w2 = w_ref[...] * (1.0 - r)                                      # (Np, 1)
    feat = r * attrs + w2 * agg                                      # (Np, Dp)
    feat_ref[...] = feat
    feat_prob_ref[...] = jnp.tanh(feat)

    # Similarity matrix: contract the feature dim of both operands directly
    # (no explicit feat.T), then temperature-scaled exp via multiply by 1/T.
    x = lax.dot_general(feat, feat, (((1,), (1,)), ((), ())),
                        preferred_element_type=jnp.float32)          # (Np, Np)
    x = jnp.exp(x * inv_t) * e

    # Column-wise min/max over the *valid* rows only.  Padded rows hold
    # exp(0)*e and would corrupt the reduction; the mask is a trace-time
    # constant and disappears entirely when n_valid == n_pad.
    if n_valid != n_pad:
        row_ids = lax.broadcasted_iota(jnp.int32, x.shape, 0)
        valid = row_ids < n_valid
        min_src = jnp.where(valid, x, jnp.inf)
        max_src = jnp.where(valid, x, -jnp.inf)
    else:
        min_src = x
        max_src = x
    min_vals = jnp.min(min_src, axis=0, keepdims=True)               # (1, Np)
    max_vals = jnp.max(max_src, axis=0, keepdims=True)               # (1, Np)

    # N reciprocals on the row + N^2 multiplies instead of N^2 divides.
    inv_den = pl.reciprocal(max_vals - min_vals + 0.0001, approx=False)
    x_ref[...] = jnp.tanh((x - min_vals) * inv_den + 0.0001)


def _pad_to(x, rows, cols):
    pr = rows - x.shape[0]
    pc = cols - x.shape[1]
    if pr == 0 and pc == 0:
        return x
    return jnp.pad(x, ((0, pr), (0, pc)))


def actor_forward(attributes, edges, T, e, r, W, *, lane=128):
    """Actor forward pass in one Pallas call (whole padded problem in VMEM)."""
    attributes = jnp.asarray(attributes, jnp.float32)
    edges = jnp.asarray(edges, jnp.float32)
    N, D = attributes.shape

    # Lane-dense padding: multiples of 128 for both N and D.  Zero padding is
    # transparent to every op except the column min/max (masked in-kernel).
    Np = ((N + lane - 1) // lane) * lane
    Dp = ((D + lane - 1) // lane) * lane

    attrs_p = _pad_to(attributes, Np, Dp)
    edges_p = _pad_to(edges, Np, Np)
    r_p = _pad_to(jnp.asarray(r, jnp.float32).reshape(-1, 1), Np, 1)
    w_p = _pad_to(jnp.asarray(W, jnp.float32).reshape(-1, 1), Np, 1)

    t_f = jnp.asarray(T, jnp.float32).reshape(())
    e_f = jnp.asarray(e, jnp.float32).reshape(())
    scal = jnp.stack([1.0 / t_f, e_f])          # [1/T, e] -> SMEM

    # VMEM budget: edges-in + x-out + one (Np,Np) temp, plus attrs/agg/feat
    # and the two (Np,Dp) outputs; 25% slack + fixed headroom, capped by HW.
    need = int(1.25 * 4 * (3 * Np * Np + 5 * Np * Dp)) + (8 << 20)
    try:
        cap = int(pltpu.get_tpu_info().vmem_capacity_bytes)
    except Exception:
        cap = 64 << 20
    vmem_limit = max(32 << 20, min(need, int(0.9 * cap)))

    kernel = functools.partial(_actor_kernel, n_valid=N, n_pad=Np)
    smem = pl.BlockSpec(memory_space=pltpu.MemorySpace.SMEM)
    vmem = pl.BlockSpec(memory_space=pltpu.MemorySpace.VMEM)

    x_p, feat_p, feat_prob_p = pl.pallas_call(
        kernel,
        out_shape=(
            jax.ShapeDtypeStruct((Np, Np), jnp.float32),   # x
            jax.ShapeDtypeStruct((Np, Dp), jnp.float32),   # feat
            jax.ShapeDtypeStruct((Np, Dp), jnp.float32),   # feat_prob
        ),
        in_specs=[smem, vmem, vmem, vmem, vmem],
        out_specs=(vmem, vmem, vmem),
        compiler_params=pltpu.CompilerParams(vmem_limit_bytes=int(vmem_limit)),
    )(scal, attrs_p, edges_p, r_p, w_p)

    return x_p[:N, :N], feat_p[:N, :D], feat_prob_p[:N, :D]


def actor_forward_ref(attributes, edges, T, e, r, W):
    """Pure-JAX reference mirroring the PyTorch forward."""
    attributes = jnp.asarray(attributes, jnp.float32)
    edges = (jnp.asarray(edges, jnp.float32) > 0).astype(jnp.float32)
    r = jnp.asarray(r, jnp.float32).reshape(-1, 1) + 1e-08
    W = jnp.asarray(W, jnp.float32).reshape(-1, 1)
    tmp = W * (edges @ attributes)
    feat = r * attributes + tmp * (1.0 - r)
    feat_prob = jnp.tanh(feat)
    x = feat @ feat.T
    x = jnp.exp(x / T) * e
    mn = jnp.min(x, axis=0)
    mx = jnp.max(x, axis=0)
    x = (x - mn) / (mx - mn + 0.0001) + 0.0001
    return jnp.tanh(x), feat, feat_prob


def _run_case(key, N, D, scale, T_param, e_param, tol):
    k_attr, k_edges, k_r, k_w = jax.random.split(key, 4)
    attributes = scale * jax.random.normal(k_attr, (N, D), dtype=jnp.float32)
    edges = jax.random.uniform(k_edges, (N, N), dtype=jnp.float32) - 0.5
    r_param = jax.random.uniform(k_r, (N,), dtype=jnp.float32)
    w_param = 0.1 * jax.random.normal(k_w, (N,), dtype=jnp.float32)

    outs = actor_forward(attributes, edges, T_param, e_param, r_param, w_param)
    jax.block_until_ready(outs)
    refs = actor_forward_ref(attributes, edges, T_param, e_param,
                             r_param, w_param)
    names = ("x", "feat", "feat_prob")
    for name, got, want in zip(names, outs, refs):
        assert got.shape == want.shape, (name, got.shape, want.shape)
        assert bool(jnp.allclose(got, want, atol=tol, rtol=tol)), (
            f"{name} mismatch (N={N}, D={D}), "
            f"max abs err={float(jnp.max(jnp.abs(got - want)))}")


if __name__ == "__main__":
    key = jax.random.PRNGKey(0)
    k1, k2 = jax.random.split(key)

    # Case 1: demo-sized graph (N=8, D=32) -> exercises padded/masked path.
    _run_case(k1, N=8, D=32, scale=1.0, T_param=2.0, e_param=1.5, tol=1e-5)

    # Case 2: lane-aligned graph (N=D=128) -> no padding, no reduction mask.
    _run_case(k2, N=128, D=128, scale=0.05, T_param=2.0, e_param=1.5, tol=1e-4)

    print("KERNEL_OK")
</pallas_src>

<mosaic_0001>
module attributes {stable_mosaic.version = 11 : i64} {
  func.func @_actor_kernel(%arg0: memref<2xf32, #tpu.memory_space<smem>>, %arg1: memref<128x128xf32, #tpu.memory_space<vmem>>, %arg2: memref<128x128xf32, #tpu.memory_space<vmem>>, %arg3: memref<128x1xf32, #tpu.memory_space<vmem>>, %arg4: memref<128x1xf32, #tpu.memory_space<vmem>>, %arg5: memref<128x128xf32, #tpu.memory_space<vmem>>, %arg6: memref<128x128xf32, #tpu.memory_space<vmem>>, %arg7: memref<128x128xf32, #tpu.memory_space<vmem>>) attributes {dimension_semantics = [], scalar_prefetch = 0 : i64, scratch_operands = 0 : i64, tpu.core_type = #tpu.core_type<tc>} {
    %c0 = arith.constant 0 : index
    %0 = memref.load %arg0[%c0] : memref<2xf32, #tpu.memory_space<smem>>
    %c1 = arith.constant 1 : index
    %1 = memref.load %arg0[%c1] : memref<2xf32, #tpu.memory_space<smem>>
    %c0_0 = arith.constant 0 : index
    %c0_1 = arith.constant 0 : index
    %2 = vector.load %arg2[%c0_0, %c0_1] : memref<128x128xf32, #tpu.memory_space<vmem>>, vector<128x128xf32>
    %cst = arith.constant 0.000000e+00 : f32
    %3 = vector.broadcast %cst : f32 to vector<128x128xf32>
    %4 = arith.cmpf ogt, %2, %3 : vector<128x128xf32>
    %5 = arith.extui %4 : vector<128x128xi1> to vector<128x128xi32>
    %6 = arith.sitofp %5 : vector<128x128xi32> to vector<128x128xf32>
    %c0_2 = arith.constant 0 : index
    %c0_3 = arith.constant 0 : index
    %7 = vector.load %arg5[%c0_2, %c0_3] : memref<128x128xf32, #tpu.memory_space<vmem>>, vector<128x128xf32>
    tpu.vector_store %arg5[%c0_2, %c0_3], %6 {strides = array<i32>} : memref<128x128xf32, #tpu.memory_space<vmem>>, vector<128x128xf32>,
    %c0_4 = arith.constant 0 : index
    %c0_5 = arith.constant 0 : index
    %8 = vector.load %arg1[%c0_4, %c0_5] : memref<128x128xf32, #tpu.memory_space<vmem>>, vector<128x128xf32>
    %c0_6 = arith.constant 0 : index
    %c0_7 = arith.constant 0 : index
    %9 = vector.load %arg5[%c0_6, %c0_7] : memref<128x128xf32, #tpu.memory_space<vmem>>, vector<128x128xf32>
    %cst_8 = arith.constant dense<0.000000e+00> : vector<128x128xf32>
    %10 = tpu.matmul %9, %8, %cst_8 {dimension_numbers = #tpu.dot_dimension_numbers<[1], [0], [0], [1], [0, 0, 1, 1], [], []>} : vector<128x128xf32>, vector<128x128xf32>, vector<128x128xf32> -> vector<128x128xf32>
    %c0_9 = arith.constant 0 : index
    %c0_10 = arith.constant 0 : index
    %11 = vector.load %arg3[%c0_9, %c0_10] : memref<128x1xf32, #tpu.memory_space<vmem>>, vector<128x1xf32>
    %cst_11 = arith.constant 9.99999993E-9 : f32
    %12 = vector.broadcast %cst_11 : f32 to vector<128x1xf32>
    %13 = arith.addf %11, %12 : vector<128x1xf32>
    %c0_12 = arith.constant 0 : index
    %c0_13 = arith.constant 0 : index
    %14 = vector.load %arg4[%c0_12, %c0_13] : memref<128x1xf32, #tpu.memory_space<vmem>>, vector<128x1xf32>
    %cst_14 = arith.constant 1.000000e+00 : f32
    %15 = vector.broadcast %cst_14 : f32 to vector<128x1xf32>
    %16 = arith.subf %15, %13 : vector<128x1xf32>
    %17 = arith.mulf %14, %16 : vector<128x1xf32>
    %18 = vector.broadcast %13 : vector<128x1xf32> to vector<128x128xf32>
    %19 = arith.mulf %18, %8 : vector<128x128xf32>
    %20 = vector.broadcast %17 : vector<128x1xf32> to vector<128x128xf32>
    %21 = arith.mulf %20, %10 : vector<128x128xf32>
    %22 = arith.addf %19, %21 : vector<128x128xf32>
    %c0_15 = arith.constant 0 : index
    %c0_16 = arith.constant 0 : index
    %23 = vector.load %arg6[%c0_15, %c0_16] : memref<128x128xf32, #tpu.memory_space<vmem>>, vector<128x128xf32>
    tpu.vector_store %arg6[%c0_15, %c0_16], %22 {strides = array<i32>} : memref<128x128xf32, #tpu.memory_space<vmem>>, vector<128x128xf32>,
    %24 = math.tanh %22 : vector<128x128xf32>
    %c0_17 = arith.constant 0 : index
    %c0_18 = arith.constant 0 : index
    %25 = vector.load %arg7[%c0_17, %c0_18] : memref<128x128xf32, #tpu.memory_space<vmem>>, vector<128x128xf32>
    tpu.vector_store %arg7[%c0_17, %c0_18], %24 {strides = array<i32>} : memref<128x128xf32, #tpu.memory_space<vmem>>, vector<128x128xf32>,
    %cst_19 = arith.constant dense<0.000000e+00> : vector<128x128xf32>
    %26 = tpu.matmul %22, %22, %cst_19 {dimension_numbers = #tpu.dot_dimension_numbers<[1], [1], [0], [0], [0, 0, 1, 0], [], []>} : vector<128x128xf32>, vector<128x128xf32>, vector<128x128xf32> -> vector<128x128xf32>
    %27 = vector.broadcast %0 : f32 to vector<128x128xf32>
    %28 = arith.mulf %26, %27 : vector<128x128xf32>
    %29 = math.exp %28 : vector<128x128xf32>
    %30 = vector.broadcast %1 : f32 to vector<128x128xf32>
    %31 = arith.mulf %29, %30 : vector<128x128xf32>
    %32 = tpu.iota {dimensions = array<i32: 0>} : vector<128x128xi32>
    %c8_i32 = arith.constant 8 : i32
    %33 = vector.broadcast %c8_i32 : i32 to vector<128x128xi32>
    %34 = arith.cmpi slt, %32, %33 : vector<128x128xi32>
    %cst_20 = arith.constant 0x7F800000 : f32
    %35 = vector.broadcast %cst_20 : f32 to vector<128x128xf32>
    %36 = arith.select %34, %31, %35 : vector<128x128xi1>, vector<128x128xf32>
    %cst_21 = arith.constant 0xFF800000 : f32
    %37 = vector.broadcast %cst_21 : f32 to vector<128x128xf32>
    %38 = arith.select %34, %31, %37 : vector<128x128xi1>, vector<128x128xf32>
    %cst_22 = arith.constant dense<0x7F800000> : vector<128xf32>
    %39 = vector.multi_reduction <minimumf>, %36, %cst_22 [0] : vector<128x128xf32> to vector<128xf32>
    %40 = vector.shape_cast %39 : vector<128xf32> to vector<1x128xf32>
    %cst_23 = arith.constant dense<0xFF800000> : vector<128xf32>
    %41 = vector.multi_reduction <maximumf>, %38, %cst_23 [0] : vector<128x128xf32> to vector<128xf32>
    %42 = vector.shape_cast %41 : vector<128xf32> to vector<1x128xf32>
    %43 = arith.subf %42, %40 : vector<1x128xf32>
    %cst_24 = arith.constant 9.99999974E-5 : f32
    %44 = vector.broadcast %cst_24 : f32 to vector<1x128xf32>
    %45 = arith.addf %43, %44 : vector<1x128xf32>
    %46 = tpu.reciprocal %45 : vector<1x128xf32> -> vector<1x128xf32>
    %47 = vector.broadcast %40 : vector<1x128xf32> to vector<128x128xf32>
    %48 = arith.subf %31, %47 : vector<128x128xf32>
    %49 = vector.broadcast %46 : vector<1x128xf32> to vector<128x128xf32>
    %50 = arith.mulf %48, %49 : vector<128x128xf32>
    %cst_25 = arith.constant 9.99999974E-5 : f32
    %51 = vector.broadcast %cst_25 : f32 to vector<128x128xf32>
    %52 = arith.addf %50, %51 : vector<128x128xf32>
    %53 = math.tanh %52 : vector<128x128xf32>
    %c0_26 = arith.constant 0 : index
    %c0_27 = arith.constant 0 : index
    %54 = vector.load %arg5[%c0_26, %c0_27] : memref<128x128xf32, #tpu.memory_space<vmem>>, vector<128x128xf32>
    tpu.vector_store %arg5[%c0_26, %c0_27], %53 {strides = array<i32>} : memref<128x128xf32, #tpu.memory_space<vmem>>, vector<128x128xf32>,
    return
  }
}

</mosaic_0001>

<bundles_post_ra>
// kernel: tpu_custom_call.1
= control target key start
LH: loop header
LB: loop body
LE: loop exit
PB: predicated region body
PF: predicated region fallthrough
CT: control target
= control target key end

     0   :  { %13 = vsyncpa [#allocation4], 0  ;;  %s1823_s0 = inlined_call_operand.vmem [shape: f32[2], index: 0, kind: input, shape index: {}]   ;;  %s1824_s1 = inlined_call_operand.vmem [shape: f32[128,128], index: 1, kind: input, shape index: {}]   ;;  %s1825_s2 = inlined_call_operand.vmem [shape: f32[128,128], index: 2, kind: input, shape index: {}]   ;;  %s1826_s3 = inlined_call_operand.vmem [shape: f32[128,1], index: 3, kind: input, shape index: {}]   ;;  %s1827_s4 = inlined_call_operand.vmem [shape: f32[128,1], index: 4, kind: input, shape index: {}]   ;;  %s1828_s5 = inlined_call_operand.hbm [shape: f32[128,128], index: 5, kind: output, shape index: {0}]   ;;  %s1829_s6 = inlined_call_operand.hbm [shape: f32[128,128], index: 6, kind: output, shape index: {1}]   ;;  %s1830_s7 = inlined_call_operand.hbm [shape: f32[128,128], index: 7, kind: output, shape index: {2}]  }
   0x1   :  { %14 = vsyncpa [#allocation3], 0 }
   0x2   :  { %15 = vsyncpa [#allocation7], 0  ;;  %s21_s26 = sshll.u32 %s1823_s0, 4  ;;  %s1221_s27 = smov [#allocation2]   ;;  %s22_s26 = int_to_ptr.vmem [resolvable:$true] %s21_s26 }
   0x3   :  { %24 = dma.vmem_to_smem %s22_s26, 16, %s1221_s27, [#allocation4]  }
   0x4   :  { %1215 = dma.done.wait [#allocation4], 16  }
   0x5   :  { %1216 = vsyncadd [#allocation4], 4294967280 }
   0x6   :  { %37 = sfence }
   0x7   :  { %v1275_v0 = vld [vmem:[%s1824_s1 + $0x78] sm:$0xff]  ;;  %v231_v2 = vld [vmem:[%s1826_s3 + $0x70] sm:$0xff]  ;;  %v230_v5 = vld [vmem:[%s1826_s3 + $0x68] sm:$0xff]  ;;  %v1222_v6 = vmov 0   ;;  %v1223_v59 = vmov 1.0   ;;  %s906_s9 = sshll.u32 %s1829_s6, 4  ;;  %s907_s9 = int_to_ptr.hbm [resolvable:$true] %s906_s9 }
   0x8   :  { %v232_v1 = vld [vmem:[%s1826_s3 + $0x78] sm:$0xff]  ;;  %152 = vmatpush.msra.mxu0 %v1275_v0  ;;  %958 = vmatpush.msra.mxu3 %v1275_v0  ;;  %v247_v4 = vadd.f32 1e-08, %v231_v2  ;;  %v246_v7 = vadd.f32 1e-08, %v230_v5  ;;  %v1291_v8 = vld [vmem:[%s1824_s1 + $0x70] sm:$0xff] }
   0x9   :  { %v248_v3 = vadd.f32 1e-08, %v232_v1  ;;  %1016 = vset.pattern.permute.xlu2 %v1222_v6  ;;  %1015 = vset.pattern.permute.xlu1 %v1222_v6  ;;  %v1296_v11 = vld [vmem:[%s1824_s1 + $0x68] sm:$0xff]  ;;  %v264_v13 = vld [vmem:[%s1827_s4 + $0x78] sm:$0xff]  ;;  %v263_v14 = vld [vmem:[%s1827_s4 + $0x70] sm:$0xff]  ;;  %s1224_s10 = smov [#allocation6]  }
   0xa   :  { %1014 = vset.pattern.permute.xlu0 %v1222_v6  ;;  %369 = vperm.xlu1 %1015, %v247_v4   ;;  %v279_v10 = vsub.f32 1.0, %v247_v4  ;;  %v278_v12 = vsub.f32 1.0, %v246_v7  ;;  %v1309_v15 = vld [vmem:[%s1824_s1 + $0x60] sm:$0xff]  ;;  %v262_v16 = vld [vmem:[%s1827_s4 + $0x68] sm:$0xff]  ;;  %v1322_v18 = vld [vmem:[%s1824_s1 + $0x58] sm:$0xff]  ;;  %s904_s0 = sshll.u32 %s1224_s10, 4  ;;  %s905_s0 = int_to_ptr.vmem [resolvable:$true] %s904_s0 }
   0xb   :  { %374 = vperm.xlu0 %1014, %v248_v3   ;;  %v280_v9 = vsub.f32 1.0, %v248_v3  ;;  %364 = vperm.xlu2 %1016, %v246_v7   ;;  %v229_v17 = vld [vmem:[%s1826_s3 + $0x60] sm:$0xff]  ;;  %v1329_v23 = vld [vmem:[%s1824_s1 + $0x50] sm:$0xff]  ;;  %v1336_v24 = vld [vmem:[%s1824_s1 + $0x48] sm:$0xff]  ;;  %s1225_s11 = smov 128   ;;  %s1226_s12 = smov 8  }
   0xc   :  { %153 = vmatpush.msra.mxu0 %v1291_v8  ;;  %959 = vmatpush.msra.mxu3 %v1291_v8  ;;  %v295_v20 = vmul.f32 %v279_v10, %v263_v14  ;;  %v294_v21 = vmul.f32 %v278_v12, %v262_v16  ;;  %v245_v22 = vadd.f32 1e-08, %v229_v17  ;;  %v1343_v26 = vld [vmem:[%s1824_s1 + $0x40] sm:$0xff]  ;;  %v228_v28 = vld [vmem:[%s1826_s3 + $0x58] sm:$0xff]  ;;  %v227_v29 = vld [vmem:[%s1826_s3 + $0x50] sm:$0xff]  ;;  %s919_s15 = sshll.u32 %s1830_s7, 4  ;;  %s920_s15 = int_to_ptr.hbm [resolvable:$true] %s919_s15 }
   0xd   :  { %v296_v19 = vmul.f32 %v280_v9, %v264_v13  ;;  %v261_v27 = vld [vmem:[%s1827_s4 + $0x60] sm:$0xff]  ;;  %v1359_v30 = vld [vmem:[%s1824_s1 + $0x38] sm:$0xff]  ;;  %v244_v32 = vadd.f32 1e-08, %v228_v28  ;;  %v243_v33 = vadd.f32 1e-08, %v227_v29 }
   0xe   :  { %154 = vmatpush.msra.mxu0 %v1296_v11  ;;  %960 = vmatpush.msra.mxu3 %v1296_v11  ;;  %v277_v25 = vsub.f32 1.0, %v245_v22  ;;  %v1367_v34 = vld [vmem:[%s1824_s1 + $0x30] sm:$0xff]  ;;  %v1373_v35 = vld [vmem:[%s1824_s1 + $0x28] sm:$0xff]  ;;  %v260_v37 = vld [vmem:[%s1827_s4 + $0x58] sm:$0xff]  ;;  %s1227_s16 = smov [#allocation8]   ;;  %s38_s6 = sld [smem:[#allocation2]] }
   0xf   :  { %v276_v36 = vsub.f32 1.0, %v244_v32  ;;  %v275_v38 = vsub.f32 1.0, %v243_v33  ;;  %v226_v39 = vld [vmem:[%s1826_s3 + $0x48] sm:$0xff]  ;;  %v1386_v40 = vld [vmem:[%s1824_s1 + $0x20] sm:$0xff]  ;;  %v259_v41 = vld [vmem:[%s1827_s4 + $0x50] sm:$0xff]  ;;  %s917_s17 = sshll.u32 %s1227_s16, 4  ;;  %s918_s17 = int_to_ptr.vmem [resolvable:$true] %s917_s17 }
  0x10   :  { %155 = vmatpush.msra.mxu0 %v1309_v15  ;;  %961 = vmatpush.msra.mxu3 %v1309_v15  ;;  %v293_v31 = vmul.f32 %v277_v25, %v261_v27  ;;  %v1396_v42 = vld [vmem:[%s1824_s1 + $0x18] sm:$0xff]  ;;  %v242_v44 = vadd.f32 1e-08, %v226_v39  ;;  %v40_v46 = vld [vmem:[%s1825_s2] sm:$0xff]  ;;  %v1406_v47 = vld [vmem:[%s1824_s1 + $0x10] sm:$0xff]  ;;  %s941_s18 = sld [smem:[#allocation2 + $0x1]] }
  0x11   :  { %v292_v43 = vmul.f32 %v276_v36, %v260_v37  ;;  %v291_v45 = vmul.f32 %v275_v38, %v259_v41  ;;  %v50_v48 = vld [vmem:[%s1825_s2 + $0x50] sm:$0xff]  ;;  %v1416_v49 = vld [vmem:[%s1824_s1 + $0x8] sm:$0xff]  ;;  %vm56_vm0 = vcmp.gt.f32.partialorder %v40_v46, 0.0  ;;  %v1426_v52 = vld [vmem:[%s1824_s1] sm:$0xff]  ;;  %s1228_s7 = smov [#allocation5]   ;;  %s893_s22 = sshll.u32 %s1828_s5, 4  ;;  %s894_s22 = int_to_ptr.hbm [resolvable:$true] %s893_s22 }
  0x12   :  { %156 = vmatpush.msra.mxu0 %v1322_v18  ;;  %962 = vmatpush.msra.mxu3 %v1322_v18  ;;  %v274_v50 = vsub.f32 1.0, %v242_v44  ;;  %vm66_vm1 = vcmp.gt.f32.partialorder %v50_v48, 0.0  ;;  %v258_v51 = vld [vmem:[%s1827_s4 + $0x48] sm:$0xff]  ;;  %v225_v53 = vld [vmem:[%s1826_s3 + $0x40] sm:$0xff]  ;;  %v224_v54 = vld [vmem:[%s1826_s3 + $0x38] sm:$0xff]  ;;  %s891_s19 = sshll.u32 %s1228_s7, 4  ;;  %s892_s19 = int_to_ptr.vmem [resolvable:$true] %s891_s19 }
  0x13   :  { %470 = vperm.xlu0 %1014, %v296_v19   ;;  %465 = vperm.xlu1 %1015, %v295_v20   ;;  %v241_v56 = vadd.f32 1e-08, %v225_v53  ;;  %v41_v57 = vld [vmem:[%s1825_s2 + $0x8] sm:$0xff]  ;;  %v240_v58 = vadd.f32 1e-08, %v224_v54  ;;  %v51_v60 = vld [vmem:[%s1825_s2 + $0x58] sm:$0xff] }
  0x14   :  { %460 = vperm.xlu2 %1016, %v294_v21   ;;  %157 = vmatpush.msra.mxu0 %v1329_v23  ;;  %v290_v55 = vmul.f32 %v274_v50, %v258_v51  ;;  %vm57_vm2 = vcmp.gt.f32.partialorder %v41_v57, 0.0  ;;  %vm67_vm3 = vcmp.gt.f32.partialorder %v51_v60, 0.0  ;;  %v257_v62 = vld [vmem:[%s1827_s4 + $0x40] sm:$0xff]  ;;  %v223_v1 = vld [vmem:[%s1826_s3 + $0x30] sm:$0xff]  ;;  %v256_v2 = vld [vmem:[%s1827_s4 + $0x38] sm:$0xff] }
  0x15   :  { %963 = vmatpush.msra.mxu3 %v1329_v23  ;;  %v273_v61 = vsub.f32 1.0, %v241_v56  ;;  %v272_v63 = vsub.f32 1.0, %v240_v58  ;;  %v239_v4 = vadd.f32 1e-08, %v223_v1  ;;  %v42_v6 = vld [vmem:[%s1825_s2 + $0x10] sm:$0xff]  ;;  %v52_v7 = vld [vmem:[%s1825_s2 + $0x60] sm:$0xff] }
  0x16   :  { %158 = vmatpush.msra.mxu0 %v1336_v24  ;;  %vm58_vm4 = vcmp.gt.f32.partialorder %v42_v6, 0.0  ;;  %vm68_vm5 = vcmp.gt.f32.partialorder %v52_v7, 0.0  ;;  %v255_v10 = vld [vmem:[%s1827_s4 + $0x30] sm:$0xff]  ;;  %v222_v12 = vld [vmem:[%s1826_s3 + $0x28] sm:$0xff]  ;;  %v221_v13 = vld [vmem:[%s1826_s3 + $0x20] sm:$0xff] }
  0x17   :  { %964 = vmatpush.msra.mxu3 %v1336_v24  ;;  %v289_v3 = vmul.f32 %v273_v61, %v257_v62  ;;  %v288_v5 = vmul.f32 %v272_v63, %v256_v2  ;;  %v271_v9 = vsub.f32 1.0, %v239_v4  ;;  %v238_v16 = vadd.f32 1e-08, %v222_v12  ;;  %v43_v17 = vld [vmem:[%s1825_s2 + $0x18] sm:$0xff]  ;;  %v53_v20 = vld [vmem:[%s1825_s2 + $0x68] sm:$0xff]  ;;  %v253_v28 = vld [vmem:[%s1827_s4 + $0x20] sm:$0xff] }
  0x18   :  { %159 = vmatpush.msra.mxu0 %v1343_v26  ;;  %v237_v19 = vadd.f32 1e-08, %v221_v13  ;;  %vm59_vm6 = vcmp.gt.f32.partialorder %v43_v17, 0.0  ;;  %vm69_vm7 = vcmp.gt.f32.partialorder %v53_v20, 0.0  ;;  %v220_v27 = vld [vmem:[%s1826_s3 + $0x18] sm:$0xff]  ;;  %v54_v36 = vld [vmem:[%s1825_s2 + $0x70] sm:$0xff] }
  0x19   :  { %965 = vmatpush.msra.mxu3 %v1343_v26  ;;  %v287_v14 = vmul.f32 %v271_v9, %v255_v10  ;;  %v270_v21 = vsub.f32 1.0, %v238_v16  ;;  %vm70_vm9 = vcmp.gt.f32.partialorder %v54_v36, 0.0  ;;  %v252_v38 = vld [vmem:[%s1827_s4 + $0x18] sm:$0xff]  ;;  %v219_v39 = vld [vmem:[%s1826_s3 + $0x10] sm:$0xff]  ;;  %v218_v41 = vld [vmem:[%s1826_s3 + $0x8] sm:$0xff] }
  0x1a   :  { %160 = vmatpush.msra.mxu0 %v1359_v30  ;;  %v269_v25 = vsub.f32 1.0, %v237_v19  ;;  %v234_v46 = vadd.f32 1e-08, %v218_v41  ;;  %v55_v48 = vld [vmem:[%s1825_s2 + $0x78] sm:$0xff]  ;;  %v251_v51 = vld [vmem:[%s1827_s4 + $0x10] sm:$0xff]  ;;  %v217_v54 = vld [vmem:[%s1826_s3] sm:$0xff] }
  0x1b   :  { %966 = vmatpush.msra.mxu3 %v1359_v30  ;;  %359 = vperm.xlu0 %1014, %v245_v22   ;;  %v254_v22 = vld [vmem:[%s1827_s4 + $0x28] sm:$0xff]  ;;  %vm71_vm11 = vcmp.gt.f32.partialorder %v55_v48, 0.0  ;;  %v233_v57 = vadd.f32 1e-08, %v217_v54  ;;  %v46_v60 = vld [vmem:[%s1825_s2 + $0x30] sm:$0xff]  ;;  %v249_v62 = vld [vmem:[%s1827_s4] sm:$0xff] }
  0x1c   :  { %455 = vperm.xlu1 %1015, %v293_v31   ;;  %354 = vperm.xlu2 %1016, %v244_v32   ;;  %v286_v29 = vmul.f32 %v270_v21, %v254_v22  ;;  %v236_v31 = vadd.f32 1e-08, %v220_v27  ;;  %v285_v32 = vmul.f32 %v269_v25, %v253_v28  ;;  %v266_v53 = vsub.f32 1.0, %v234_v46  ;;  %v47_v1 = vld [vmem:[%s1825_s2 + $0x38] sm:$0xff]  ;;  %v48_v2 = vld [vmem:[%s1825_s2 + $0x40] sm:$0xff] }
  0x1d   :  { %161 = vmatpush.msra.mxu0 %v1367_v34  ;;  %967 = vmatpush.msra.mxu3 %v1367_v34  ;;  %vm62_vm12 = vcmp.gt.f32.partialorder %v46_v60, 0.0  ;;  %v265_v61 = vsub.f32 1.0, %v233_v57  ;;  %vm63_vm13 = vcmp.gt.f32.partialorder %v47_v1, 0.0  ;;  %vm64_vm14 = vcmp.gt.f32.partialorder %v48_v2, 0.0 }
  0x1e   :  { %v268_v37 = vsub.f32 1.0, %v236_v31 }
  0x1f   :  { %162 = vmatpush.msra.mxu0 %v1373_v35  ;;  %968 = vmatpush.msra.mxu3 %v1373_v35  ;;  %v281_v63 = vmul.f32 %v265_v61, %v249_v62 }
  0x21   :  { %163 = vmatpush.msra.mxu0 %v1386_v40  ;;  %969 = vmatpush.msra.mxu3 %v1386_v40 }
  0x23   :  { %164 = vmatpush.msra.mxu0 %v1396_v42  ;;  %970 = vmatpush.msra.mxu3 %v1396_v42 }
  0x24   :  { %450 = vperm.xlu0 %1014, %v292_v43   ;;  %349 = vperm.xlu1 %1015, %v243_v33   ;;  %v44_v33 = vld [vmem:[%s1825_s2 + $0x20] sm:$0xff]  ;;  %v284_v43 = vmul.f32 %v268_v37, %v252_v38 }
  0x25   :  { %445 = vperm.xlu2 %1016, %v291_v45   ;;  %165 = vmatpush.msra.mxu0 %v1406_v47  ;;  %vm60_vm8 = vcmp.gt.f32.partialorder %v44_v33, 0.0  ;;  %v45_v45 = vld [vmem:[%s1825_s2 + $0x28] sm:$0xff] }
  0x26   :  { %971 = vmatpush.msra.mxu3 %v1406_v47  ;;  %vm61_vm10 = vcmp.gt.f32.partialorder %v45_v45, 0.0 }
  0x27   :  { %166 = vmatpush.msra.mxu0 %v1416_v49 }
  0x28   :  { %972 = vmatpush.msra.mxu3 %v1416_v49 }
  0x29   :  { %167 = vmatpush.msra.mxu0 %v1426_v52 }
  0x2a   :  { %973 = vmatpush.msra.mxu3 %v1426_v52  ;;  %1115 = vmatmul.msk.f32.vlgmr.msra.gmra.mxu0 %vm56_vm0, %v1223_v59 }
  0x2b   :  { %1116 = vmatmul.msk.f32.vlgmr.msra.gmra.mxu3 %vm66_vm1, %v1223_v59 }
  0x2c   :  { %344 = vperm.xlu0 %1014, %v242_v44   ;;  %440 = vperm.xlu1 %1015, %v290_v55   ;;  %v235_v44 = vadd.f32 1e-08, %v219_v39  ;;  %v250_v55 = vld [vmem:[%s1827_s4 + $0x8] sm:$0xff] }
  0x2d   :  { %339 = vperm.xlu2 %1016, %v241_v56  }
  0x2e   :  { %v267_v50 = vsub.f32 1.0, %v235_v44 }
  0x30   :  { %v283_v56 = vmul.f32 %v267_v50, %v251_v51 }
  0x32   :  { %1117 = vmatmul.msk.f32.gmra.mxu0 %vm57_vm2, %v1223_v59 }
  0x33   :  { %1118 = vmatmul.msk.f32.gmra.mxu3 %vm67_vm3, %v1223_v59 }
  0x34   :  { %435 = vperm.xlu0 %1014, %v289_v3   ;;  %334 = vperm.xlu1 %1015, %v240_v58   ;;  %v282_v58 = vmul.f32 %v266_v53, %v250_v55  ;;  %v49_v3 = vld [vmem:[%s1825_s2 + $0x48] sm:$0xff] }
  0x35   :  { %430 = vperm.xlu2 %1016, %v288_v5   ;;  %vm65_vm15 = vcmp.gt.f32.partialorder %v49_v3, 0.0 }
  0x3a   :  { %1119 = vmatmul.msk.f32.gmra.mxu0 %vm58_vm4, %v1223_v59 }
  0x3b   :  { %1120 = vmatmul.msk.f32.gmra.mxu3 %vm68_vm5, %v1223_v59 }
  0x3c   :  { %329 = vperm.xlu0 %1014, %v239_v4   ;;  %425 = vperm.xlu1 %1015, %v287_v14  }
  0x3d   :  { %324 = vperm.xlu2 %1016, %v238_v16  }
  0x42   :  { %1121 = vmatmul.msk.f32.gmra.mxu0 %vm59_vm6, %v1223_v59 }
  0x43   :  { %1122 = vmatmul.msk.f32.gmra.mxu3 %vm69_vm7, %v1223_v59 }
  0x44   :  { %420 = vperm.xlu0 %1014, %v286_v29   ;;  %319 = vperm.xlu1 %1015, %v237_v19  }
  0x45   :  { %415 = vperm.xlu2 %1016, %v285_v32  }
  0x4a   :  { %1123 = vmatmul.msk.f32.gmra.mxu0 %vm60_vm8, %v1223_v59 }
  0x4b   :  { %1124 = vmatmul.msk.f32.gmra.mxu3 %vm70_vm9, %v1223_v59 }
  0x4c   :  { %314 = vperm.xlu0 %1014, %v236_v31   ;;  %410 = vperm.xlu1 %1015, %v284_v43  }
  0x4d   :  { %309 = vperm.xlu2 %1016, %v235_v44  }
  0x52   :  { %1125 = vmatmul.msk.f32.gmra.mxu0 %vm61_vm10, %v1223_v59 }
  0x53   :  { %1126 = vmatmul.msk.f32.gmra.mxu3 %vm71_vm11, %v1223_v59 }
  0x54   :  { %405 = vperm.xlu0 %1014, %v283_v56   ;;  %304 = vperm.xlu1 %1015, %v234_v46  }
  0x55   :  { %400 = vperm.xlu2 %1016, %v282_v58  }
  0x5a   :  { %1127 = vmatmul.msk.f32.gmra.mxu0 %vm62_vm12, %v1223_v59 }
  0x5c   :  { %299 = vperm.xlu0 %1014, %v233_v57   ;;  %395 = vperm.xlu1 %1015, %v281_v63  }
  0x62   :  { %1128 = vmatmul.msk.f32.gmra.mxu0 %vm63_vm13, %v1223_v59 }
  0x65   :  { %v365_v4 = vpop.permute.xlu2 %364 }
  0x6a   :  { %1129 = vmatmul.msk.f32.gmra.mxu0 %vm64_vm14, %v1223_v59 }
  0x6e   :  { %v461_v5 = vpop.permute.xlu2 %460 }
  0x72   :  { %1130 = vmatmul.msk.f32.gmra.mxu0 %vm65_vm15, %v1223_v59 }
  0x76   :  { %v355_v9 = vpop.permute.xlu2 %354 }
  0x77   :  { %v388_v43 = vmul.f32 %v355_v9, %v1322_v18 }
  0x7c   :  { %v1546_v6 = vpop.permute.xlu1 %369 }
  0x7d   :  { %v1548_v7 = vpop.permute.xlu0 %374 }
  0x7f   :  { %v446_v13 = vpop.permute.xlu2 %445 }
  0x85   :  { %v1550_v10 = vpop.permute.xlu0 %470  ;;  %v1552_v12 = vpop.permute.xlu1 %465 }
  0x87   :  { %v1554_v17 = vpop.permute.xlu2 %339 }
  0x8d   :  { %v360_v14 = vpop.permute.xlu0 %359 }
  0x8e   :  { %v456_v16 = vpop.permute.xlu1 %455  ;;  %v389_v54 = vmul.f32 %v360_v14, %v1309_v15  ;;  %v390_v15 = vmul.f32 %v365_v4, %v1296_v11 }
  0x8f   :  { %v1556_v21 = vpop.permute.xlu2 %430 }
  0x96   :  { %v451_v19 = vpop.permute.xlu0 %450  ;;  %v350_v20 = vpop.permute.xlu1 %349 }
  0x97   :  { %v1566_v28 = vpop.permute.xlu2 %324  ;;  %v387_v31 = vmul.f32 %v350_v20, %v1329_v23 }
  0x9e   :  { %v1558_v59 = vpop.permute.xlu0 %344  ;;  %v1560_v22 = vpop.permute.xlu1 %440 }
  0x9f   :  { %v416_v39 = vpop.permute.xlu2 %415 }
  0xa6   :  { %v1562_v25 = vpop.permute.xlu0 %435  ;;  %v1564_v27 = vpop.permute.xlu1 %334 }
  0xa7   :  { %v1568_v29 = vpop.f32.mrf.mxu0  ;;  %v310_v53 = vpop.permute.xlu2 %309 }
  0xa8   :  { %v379_v2 = vmul.f32 %v310_v53, %v1406_v47 }
  0xae   :  { %v199_v32 = vpop.f32.mrf.mxu3  ;;  %v1571_v33 = vpop.permute.xlu0 %329 }
  0xaf   :  { %v483_v36 = vmul.f32 %v446_v13, %v199_v32  ;;  %v1573_v37 = vpop.permute.xlu1 %425  ;;  %v172_v38 = vpop.f32.mrf.mxu0 }
  0xb0   :  { %v401_v3 = vpop.permute.xlu2 %400 }
  0xb1   :  { %v1575_v41 = vadd.f32 %v483_v36, %v387_v31 }
  0xb3   :  { %515 = vst [vmem:[#allocation6 + $0x50] sm:$0xff] %v1575_v41  ;;  %1017 = vtanh.f32 %v1575_v41 }
  0xb6   :  { %v202_v44 = vpop.f32.mrf.mxu3  ;;  %v1580_v45 = vpop.permute.xlu0 %420 }
  0xb7   :  { %v484_v23 = vmul.f32 %v451_v19, %v202_v44  ;;  %v320_v46 = vpop.permute.xlu1 %319  ;;  %v175_v48 = vpop.f32.mrf.mxu0  ;;  %v474_v19 = vmul.f32 %v401_v3, %v172_v38  ;;  %v391_v38 = vmul.f32 %v1546_v6, %v1291_v8 }
  0xb8   :  { %v381_v36 = vmul.f32 %v320_v46, %v1386_v40 }
  0xb9   :  { %v1018_v50 = vpop.eup %1017  ;;  %v1582_v51 = vadd.f32 %v484_v23, %v388_v43 }
  0xba   :  { %547 = vst [vmem:[#allocation8 + $0x50] sm:$0xff] %v1018_v50 }
  0xbb   :  { %516 = vst [vmem:[#allocation6 + $0x58] sm:$0xff] %v1582_v51  ;;  %1019 = vtanh.f32 %v1582_v51 }
  0xbe   :  { %v205_v55 = vpop.f32.mrf.mxu3  ;;  %v315_v56 = vpop.permute.xlu0 %314 }
  0xbf   :  { %v485_v18 = vmul.f32 %v456_v16, %v205_v55  ;;  %v380_v57 = vmul.f32 %v315_v56, %v1396_v42  ;;  %v411_v58 = vpop.permute.xlu1 %410  ;;  %v178_v60 = vpop.f32.mrf.mxu0 }
  0xc0   :  { %v476_v63 = vmul.f32 %v411_v58, %v178_v60  ;;  %v383_v58 = vmul.f32 %v1571_v33, %v1367_v34 }
  0xc1   :  { %v1020_v61 = vpop.eup %1019  ;;  %v1588_v62 = vadd.f32 %v485_v18, %v389_v54  ;;  %v382_v54 = vmul.f32 %v1566_v28, %v1373_v35  ;;  %v392_v28 = vmul.f32 %v1548_v7, %v1275_v0 }
  0xc2   :  { %548 = vst [vmem:[#allocation8 + $0x58] sm:$0xff] %v1020_v61  ;;  %v1592_v1 = vadd.f32 %v476_v63, %v380_v57 }
  0xc3   :  { %517 = vst [vmem:[#allocation6 + $0x60] sm:$0xff] %v1588_v62  ;;  %1021 = vtanh.f32 %v1588_v62 }
  0xc4   :  { %508 = vst [vmem:[#allocation6 + $0x18] sm:$0xff] %v1592_v1  ;;  %1023 = vtanh.f32 %v1592_v1 }
  0xc6   :  { %v208_v42 = vpop.f32.mrf.mxu3  ;;  %v406_v9 = vpop.permute.xlu0 %405 }
  0xc7   :  { %v486_v13 = vmul.f32 %v461_v5, %v208_v42  ;;  %v475_v14 = vmul.f32 %v406_v9, %v175_v48  ;;  %v305_v16 = vpop.permute.xlu1 %304  ;;  %v181_v31 = vpop.f32.mrf.mxu0 }
  0xc8   :  { %v378_v20 = vmul.f32 %v305_v16, %v1416_v49  ;;  %v477_v4 = vmul.f32 %v416_v39, %v181_v31  ;;  %v1734_v16 = vstv %s941_s18 }
  0xc9   :  { %v1022_v32 = vpop.eup %1021  ;;  %v1600_v11 = vadd.f32 %v486_v13, %v390_v15  ;;  %v1602_v47 = vadd.f32 %v475_v14, %v379_v2 }
  0xca   :  { %549 = vst [vmem:[#allocation8 + $0x60] sm:$0xff] %v1022_v32  ;;  %v1604_v43 = vadd.f32 %v474_v19, %v378_v20  ;;  %v1024_v44 = vpop.eup %1023  ;;  %v1608_v5 = vadd.f32 %v477_v4, %v381_v36 }
  0xcb   :  { %518 = vst [vmem:[#allocation6 + $0x68] sm:$0xff] %v1600_v11  ;;  %1025 = vtanh.f32 %v1600_v11 }
  0xcc   :  { %540 = vst [vmem:[#allocation8 + $0x18] sm:$0xff] %v1024_v44  ;;  %1027 = vtanh.f32 %v1602_v47 }
  0xcd   :  { %507 = vst [vmem:[#allocation6 + $0x10] sm:$0xff] %v1602_v47  ;;  %1029 = vtanh.f32 %v1604_v43 }
  0xce   :  { %506 = vst [vmem:[#allocation6 + $0x8] sm:$0xff] %v1604_v43  ;;  %1031 = vtanh.f32 %v1608_v5  ;;  %v211_v40 = vpop.f32.mrf.mxu3  ;;  %v300_v49 = vpop.permute.xlu0 %299 }
  0xcf   :  { %509 = vst [vmem:[#allocation6 + $0x20] sm:$0xff] %v1608_v5  ;;  %v487_v39 = vmul.f32 %v1552_v12, %v211_v40  ;;  %v377_v23 = vmul.f32 %v300_v49, %v1426_v52  ;;  %v396_v46 = vpop.permute.xlu1 %395  ;;  %v184_v50 = vpop.f32.mrf.mxu0 }
  0xd0   :  { %v473_v48 = vmul.f32 %v396_v46, %v1568_v29  ;;  %v478_v56 = vmul.f32 %v1580_v45, %v184_v50 }
  0xd1   :  { %v1026_v53 = vpop.eup %1025  ;;  %v1623_v55 = vadd.f32 %v487_v39, %v391_v38 }
  0xd2   :  { %v1028_v18 = vpop.eup %1027  ;;  %550 = vst [vmem:[#allocation8 + $0x68] sm:$0xff] %v1026_v53  ;;  %v1626_v8 = vadd.f32 %v473_v48, %v377_v23  ;;  %v1629_v52 = vadd.f32 %v478_v56, %v382_v54 }
  0xd3   :  { %v1030_v6 = vpop.eup %1029  ;;  %539 = vst [vmem:[#allocation8 + $0x10] sm:$0xff] %v1028_v18  ;;  %1033 = vtanh.f32 %v1623_v55 }
  0xd4   :  { %v1032_v12 = vpop.eup %1031  ;;  %538 = vst [vmem:[#allocation8 + $0x8] sm:$0xff] %v1030_v6  ;;  %1035 = vtanh.f32 %v1626_v8 }
  0xd5   :  { %541 = vst [vmem:[#allocation8 + $0x20] sm:$0xff] %v1032_v12  ;;  %1037 = vtanh.f32 %v1629_v52 }
  0xd6   :  { %519 = vst [vmem:[#allocation6 + $0x70] sm:$0xff] %v1623_v55  ;;  %v214_v35 = vpop.f32.mrf.mxu3 }
  0xd7   :  { %505 = vst [vmem:[#allocation6] sm:$0xff] %v1626_v8  ;;  %v488_v29 = vmul.f32 %v1550_v10, %v214_v35  ;;  %v187_v45 = vpop.f32.mrf.mxu0  ;;  %v384_v10 = vmul.f32 %v1564_v27, %v1359_v30 }
  0xd8   :  { %510 = vst [vmem:[#allocation6 + $0x28] sm:$0xff] %v1629_v52  ;;  %v479_v61 = vmul.f32 %v1573_v37, %v187_v45 }
  0xd9   :  { %v1034_v57 = vpop.eup %1033  ;;  %v1641_v60 = vadd.f32 %v488_v29, %v392_v28 }
  0xda   :  { %v1036_v63 = vpop.eup %1035  ;;  %551 = vst [vmem:[#allocation8 + $0x70] sm:$0xff] %v1034_v57  ;;  %v1645_v0 = vadd.f32 %v479_v61, %v383_v58 }
  0xdb   :  { %v1038_v15 = vpop.eup %1037  ;;  %537 = vst [vmem:[#allocation8] sm:$0xff] %v1036_v63  ;;  %1039 = vtanh.f32 %v1641_v60  ;;  %553 = vmatpush.xpose.msra.mxu1 %v1641_v60  ;;  %974 = vmatpush.xpose.msra.mxu2 %v1641_v60 }
  0xdc   :  { %542 = vst [vmem:[#allocation8 + $0x28] sm:$0xff] %v1038_v15  ;;  %975 = vmatpush.xpose.msrb.mxu3 %v1641_v60  ;;  %1041 = vtanh.f32 %v1645_v0 }
  0xdd   :  { %520 = vst [vmem:[#allocation6 + $0x78] sm:$0xff] %v1641_v60 }
  0xde   :  { %511 = vst [vmem:[#allocation6 + $0x30] sm:$0xff] %v1645_v0 }
  0xdf   :  { %554 = vmatpush.xpose.msra.mxu1 %v1623_v55  ;;  %976 = vmatpush.xpose.msra.mxu2 %v1623_v55  ;;  %v190_v34 = vpop.f32.mrf.mxu0 }
  0xe0   :  { %977 = vmatpush.xpose.msrb.mxu3 %v1623_v55  ;;  %v480_v33 = vmul.f32 %v1556_v21, %v190_v34  ;;  %v385_v21 = vmul.f32 %v1554_v17, %v1343_v26  ;;  %v386_v17 = vmul.f32 %v1558_v59, %v1336_v24  ;;  %v1731_v24 = vstv %s38_s6 }
  0xe1   :  { %v1040_v7 = vpop.eup %1039 }
  0xe2   :  { %552 = vst [vmem:[#allocation8 + $0x78] sm:$0xff] %v1040_v7  ;;  %v1042_v37 = vpop.eup %1041  ;;  %v1659_v2 = vadd.f32 %v480_v33, %v384_v10 }
  0xe3   :  { %555 = vmatpush.xpose.msra.mxu1 %v1600_v11  ;;  %978 = vmatpush.xpose.msra.mxu2 %v1600_v11  ;;  %543 = vst [vmem:[#allocation8 + $0x30] sm:$0xff] %v1042_v37 }
  0xe4   :  { %979 = vmatpush.xpose.msrb.mxu3 %v1600_v11  ;;  %512 = vst [vmem:[#allocation6 + $0x38] sm:$0xff] %v1659_v2  ;;  %1043 = vtanh.f32 %v1659_v2 }
  0xe7   :  { %556 = vmatpush.xpose.msra.mxu1 %v1588_v62  ;;  %980 = vmatpush.xpose.msra.mxu2 %v1588_v62  ;;  %v193_v30 = vpop.f32.mrf.mxu0 }
  0xe8   :  { %981 = vmatpush.xpose.msrb.mxu3 %v1588_v62  ;;  %v481_v27 = vmul.f32 %v1562_v25, %v193_v30 }
  0xea   :  { %v1044_v3 = vpop.eup %1043  ;;  %v497_v42 = vadd.f32 %v481_v27, %v385_v21 }
  0xeb   :  { %557 = vmatpush.xpose.msra.mxu1 %v1582_v51  ;;  %982 = vmatpush.xpose.msra.mxu2 %v1582_v51  ;;  %544 = vst [vmem:[#allocation8 + $0x38] sm:$0xff] %v1044_v3 }
  0xec   :  { %983 = vmatpush.xpose.msrb.mxu3 %v1582_v51  ;;  %513 = vst [vmem:[#allocation6 + $0x40] sm:$0xff] %v497_v42  ;;  %1045 = vtanh.f32 %v497_v42 }
  0xef   :  { %558 = vmatpush.xpose.msra.mxu1 %v1575_v41  ;;  %984 = vmatpush.xpose.msra.mxu2 %v1575_v41  ;;  %v196_v26 = vpop.f32.mrf.mxu0 }
  0xf0   :  { %985 = vmatpush.xpose.msrb.mxu3 %v1575_v41  ;;  %v482_v25 = vmul.f32 %v1560_v22, %v196_v26 }
  0xf2   :  { %v1046_v9 = vpop.eup %1045  ;;  %v498_v13 = vadd.f32 %v482_v25, %v386_v17 }
  0xf3   :  { %545 = vst [vmem:[#allocation8 + $0x40] sm:$0xff] %v1046_v9 }
  0xf4   :  { %514 = vst [vmem:[#allocation6 + $0x48] sm:$0xff] %v498_v13  ;;  %1047 = vtanh.f32 %v498_v13  ;;  %559 = vmatpush.xpose.msra.mxu1 %v498_v13  ;;  %986 = vmatpush.xpose.msra.mxu2 %v498_v13 }
  0xf5   :  { %987 = vmatpush.xpose.msrb.mxu3 %v498_v13  ;;  %912 = dma.vmem_to_hbm [thread:$0]  %s905_s0, 2048, %s907_s9, [#allocation7], %s1225_s11, %s1225_s11, %s1226_s12  }
  0xf8   :  { %560 = vmatpush.xpose.msra.mxu1 %v497_v42  ;;  %988 = vmatpush.xpose.msra.mxu2 %v497_v42 }
  0xf9   :  { %989 = vmatpush.xpose.msrb.mxu3 %v497_v42 }
  0xfa   :  { %v1048_v14 = vpop.eup %1047 }
  0xfb   :  { %546 = vst [vmem:[#allocation8 + $0x48] sm:$0xff] %v1048_v14 }
  0xfc   :  { %561 = vmatpush.xpose.msra.mxu1 %v1659_v2  ;;  %990 = vmatpush.xpose.msra.mxu2 %v1659_v2  ;;  %925 = dma.vmem_to_hbm [thread:$0]  %s918_s17, 2048, %s920_s15, [#allocation7], %s1225_s11, %s1225_s11, %s1226_s12  }
  0xfd   :  { %991 = vmatpush.xpose.msrb.mxu3 %v1659_v2 }
 0x100   :  { %562 = vmatpush.xpose.msra.mxu1 %v1645_v0  ;;  %992 = vmatpush.xpose.msra.mxu2 %v1645_v0 }
 0x101   :  { %993 = vmatpush.xpose.msrb.mxu3 %v1645_v0 }
 0x104   :  { %563 = vmatpush.xpose.msra.mxu1 %v1629_v52  ;;  %994 = vmatpush.xpose.msra.mxu2 %v1629_v52 }
 0x105   :  { %995 = vmatpush.xpose.msrb.mxu3 %v1629_v52 }
 0x108   :  { %564 = vmatpush.xpose.msra.mxu1 %v1608_v5  ;;  %996 = vmatpush.xpose.msra.mxu2 %v1608_v5 }
 0x109   :  { %997 = vmatpush.xpose.msrb.mxu3 %v1608_v5 }
 0x10c   :  { %565 = vmatpush.xpose.msra.mxu1 %v1592_v1  ;;  %998 = vmatpush.xpose.msra.mxu2 %v1592_v1 }
 0x10d   :  { %999 = vmatpush.xpose.msrb.mxu3 %v1592_v1 }
 0x110   :  { %566 = vmatpush.xpose.msra.mxu1 %v1602_v47  ;;  %1000 = vmatpush.xpose.msra.mxu2 %v1602_v47 }
 0x111   :  { %1001 = vmatpush.xpose.msrb.mxu3 %v1602_v47 }
 0x114   :  { %567 = vmatpush.xpose.msra.mxu1 %v1604_v43  ;;  %1002 = vmatpush.xpose.msra.mxu2 %v1604_v43 }
 0x115   :  { %1003 = vmatpush.xpose.msrb.mxu3 %v1604_v43 }
 0x118   :  { %568 = vmatpush.xpose.msra.mxu1 %v1626_v8  ;;  %1004 = vmatpush.xpose.msra.mxu2 %v1626_v8 }
 0x119   :  { %1005 = vmatpush.xpose.msrb.mxu3 %v1626_v8 }
 0x11b   :  { %569 = vmatmul.f32.vlgmr.msra.gmra.mxu1 %v1626_v8  ;;  %587 = vmatmul.f32.vlgmr.msra.gmra.mxu2 %v1645_v0 }
 0x11c   :  { %608 = vmatmul.f32.vlgmr.msrb.gmra.mxu3 %v1600_v11 }
 0x123   :  { %572 = vmatmul.f32.gmra.mxu1 %v1604_v43  ;;  %590 = vmatmul.f32.gmra.mxu2 %v1659_v2 }
 0x124   :  { %611 = vmatmul.f32.gmra.mxu3 %v1623_v55 }
 0x12b   :  { %575 = vmatmul.f32.gmra.mxu1 %v1602_v47  ;;  %593 = vmatmul.f32.gmra.mxu2 %v497_v42 }
 0x12c   :  { %614 = vmatmul.f32.gmra.mxu3 %v1641_v60 }
 0x133   :  { %578 = vmatmul.f32.gmra.mxu1 %v1592_v1  ;;  %596 = vmatmul.f32.gmra.mxu2 %v498_v13 }
 0x13b   :  { %581 = vmatmul.f32.gmra.mxu1 %v1608_v5  ;;  %599 = vmatmul.f32.gmra.mxu2 %v1575_v41 }
 0x143   :  { %584 = vmatmul.f32.gmra.mxu1 %v1629_v52  ;;  %602 = vmatmul.f32.gmra.mxu2 %v1582_v51 }
 0x14b   :  { %605 = vmatmul.f32.gmra.mxu2 %v1588_v62 }
 0x198   :  { %v570_v59 = vpop.f32.mrf.mxu1 }
 0x199   :  { %v619_v22 = vmul.f32 %v1731_v24, %v570_v59 }
 0x19b   :  { %v635_v41 = vmul.f32 1.442695, %v619_v22 }
 0x19d   :  { %1049 = vpow2.f32 %v635_v41 }
 0x19e   :  { %v588_v51 = vpop.f32.mrf.mxu2 }
 0x19f   :  { %v609_v62 = vpop.f32.mrf.mxu3  ;;  %v625_v43 = vmul.f32 %v1731_v24, %v588_v51 }
 0x1a0   :  { %v573_v1 = vpop.f32.mrf.mxu1  ;;  %v632_v40 = vmul.f32 %v1731_v24, %v609_v62 }
 0x1a1   :  { %v620_v49 = vmul.f32 %v1731_v24, %v573_v1  ;;  %v647_v46 = vmul.f32 1.442695, %v625_v43 }
 0x1a2   :  { %v661_v54 = vmul.f32 1.442695, %v632_v40 }
 0x1a3   :  { %v1050_v19 = vpop.eup %1049  ;;  %v637_v56 = vmul.f32 1.442695, %v620_v49  ;;  %1051 = vpow2.f32 %v647_v46 }
 0x1a4   :  { %v1737_v20 = vmul.f32 %v1050_v19, %v1734_v16  ;;  %1053 = vpow2.f32 %v661_v54 }
 0x1a5   :  { %1055 = vpow2.f32 %v637_v56 }
 0x1a6   :  { %v764_v31 = vrot.slane %v1737_v20, 4  ;;  %v591_v32 = vpop.f32.mrf.mxu2 }
 0x1a7   :  { %v612_v36 = vpop.f32.mrf.mxu3  ;;  %v626_v23 = vmul.f32 %v1731_v24, %v591_v32 }
 0x1a8   :  { %v765_v11 = vmin.f32 %v1737_v20, %v764_v31  ;;  %v786_v47 = vmax.f32 %v1737_v20, %v764_v31  ;;  %v576_v4 = vpop.f32.mrf.mxu1  ;;  %v633_v48 = vmul.f32 %v1731_v24, %v612_v36 }
 0x1a9   :  { %v621_v18 = vmul.f32 %v1731_v24, %v576_v4  ;;  %v649_v12 = vmul.f32 1.442695, %v626_v23  ;;  %v1052_v34 = vpop.eup %1051 }
 0x1aa   :  { %v766_v44 = vrot.slane %v765_v11, 2  ;;  %v787_v5 = vrot.slane %v786_v47, 2  ;;  %v663_v28 = vmul.f32 1.442695, %v633_v48  ;;  %v1054_v33 = vpop.eup %1053  ;;  %v674_v9 = vmul.f32 %v1052_v34, %v1734_v16 }
 0x1ab   :  { %v639_v58 = vmul.f32 1.442695, %v621_v18  ;;  %1057 = vpow2.f32 %v649_v12  ;;  %v1056_v2 = vpop.eup %1055  ;;  %v681_v13 = vmul.f32 %v1054_v33, %v1734_v16 }
 0x1ac   :  { %v767_v38 = vmin.f32 %v765_v11, %v766_v44  ;;  %v788_v39 = vmax.f32 %v786_v47, %v787_v5  ;;  %1059 = vpow2.f32 %v663_v28  ;;  %v669_v14 = vmul.f32 %v1056_v2, %v1734_v16 }
 0x1ae   :  { %v768_v50 = vrot.slane %v767_v38, 1  ;;  %v789_v53 = vrot.slane %v788_v39, 1  ;;  %v594_v55 = vpop.f32.mrf.mxu2 }
 0x1af   :  { %v615_v8 = vpop.f32.mrf.mxu3  ;;  %v627_v29 = vmul.f32 %v1731_v24, %v594_v55 }
 0x1b0   :  { %v1748_v6 = vmin.f32 %v767_v38, %v768_v50  ;;  %v790_v52 = vmax.f32 %v788_v39, %v789_v53  ;;  %v579_v35 = vpop.f32.mrf.mxu1  ;;  %v634_v57 = vmul.f32 %v1731_v24, %v615_v8 }
 0x1b1   :  { %v622_v60 = vmul.f32 %v1731_v24, %v579_v35  ;;  %v651_v63 = vmul.f32 1.442695, %v627_v29  ;;  %v1058_v27 = vpop.eup %1057 }
 0x1b2   :  { %v791_v45 = vsub.f32 %v790_v52, %v1748_v6  ;;  %v665_v15 = vmul.f32 1.442695, %v634_v57  ;;  %v1060_v3 = vpop.eup %1059  ;;  %v675_v59 = vmul.f32 %v1058_v27, %v1734_v16  ;;  %v807_v62 = vsub.f32 %v1737_v20, %v1748_v6 }
 0x1b3   :  { %v641_v7 = vmul.f32 1.442695, %v622_v60  ;;  %v682_v1 = vmul.f32 %v1060_v3, %v1734_v16  ;;  %v813_v11 = vsub.f32 %v674_v9, %v1748_v6  ;;  %v820_v49 = vsub.f32 %v681_v13, %v1748_v6 }
 0x1b4   :  { %v1754_v61 = vadd.f32 0.0001, %v791_v45  ;;  %v808_v38 = vsub.f32 %v669_v14, %v1748_v6  ;;  %v814_v39 = vsub.f32 %v675_v59, %v1748_v6 }
 0x1b5   :  { %v821_v50 = vsub.f32 %v682_v1, %v1748_v6 }
 0x1b6   :  { %1061 = vrcp.f32 %v1754_v61  ;;  %v597_v0 = vpop.f32.mrf.mxu2  ;;  %v802_v32 = vand.u32 2147483647, %v1754_v61  ;;  %v804_v36 = vand.u32 2147483648, %v1754_v61  ;;  %vm798_vm1 = vweird.f32 %v1754_v61 }
 0x1b7   :  { %1063 = vpow2.f32 %v639_v58  ;;  %v628_v10 = vmul.f32 %v1731_v24, %v597_v0 }
 0x1b8   :  { %v582_v37 = vpop.f32.mrf.mxu1  ;;  %1065 = vpow2.f32 %v651_v63  ;;  %v805_v54 = vor.u32 1.1754944e-38, %v804_v36  ;;  %vm803_vm3 = vcmp.eq.f32.partialorder %v802_v32, 8.507059e+37 }
 0x1b9   :  { %v653_v30 = vmul.f32 1.442695, %v628_v10  ;;  %v623_v21 = vmul.f32 %v1731_v24, %v582_v37  ;;  %1067 = vpow2.f32 %v665_v15 }
 0x1ba   :  { %1069 = vpow2.f32 %v641_v7 }
 0x1bb   :  { %v643_v42 = vmul.f32 1.442695, %v623_v21  ;;  %1071 = vpow2.f32 %v653_v30 }
 0x1bc   :  { %v1062_v26 = vpop.eup %1061 }
 0x1bd   :  { %v1064_v17 = vpop.eup %1063  ;;  %v794_v25 = vmul.f32 %v1062_v26, %v1754_v61  ;;  %1073 = vpow2.f32 %v643_v42  ;;  %vm799_vm0 = vweird.f32 %v1062_v26 }
 0x1be   :  { %v600_v22 = vpop.f32.mrf.mxu2  ;;  %v1066_v41 = vpop.eup %1065  ;;  %v670_v47 = vmul.f32 %v1064_v17, %v1734_v16  ;;  %vm800_vm2 = vmor %vm798_vm1, %vm799_vm0 }
 0x1bf   :  { %v795_v51 = vsub.f32 1.0, %v794_v25  ;;  %v629_v19 = vmul.f32 %v1731_v24, %v600_v22  ;;  %v1068_v31 = vpop.eup %1067  ;;  %v676_v23 = vmul.f32 %v1066_v41, %v1734_v16 }
 0x1c0   :  { %v585_v4 = vpop.f32.mrf.mxu1  ;;  %v1070_v43 = vpop.eup %1069  ;;  %v809_v55 = vsub.f32 %v670_v47, %v1748_v6  ;;  %v683_v56 = vmul.f32 %v1068_v31, %v1734_v16 }
 0x1c1   :  { %v796_v44 = vmul.f32 %v1062_v26, %v795_v51  ;;  %v655_v5 = vmul.f32 1.442695, %v629_v19  ;;  %v624_v20 = vmul.f32 %v1731_v24, %v585_v4  ;;  %v1072_v40 = vpop.eup %1071  ;;  %v815_v12 = vsub.f32 %v676_v23, %v1748_v6 }
 0x1c2   :  { %v677_v8 = vmul.f32 %v1072_v40, %v1734_v16  ;;  %v671_v35 = vmul.f32 %v1070_v43, %v1734_v16  ;;  %v822_v0 = vsub.f32 %v683_v56, %v1748_v6 }
 0x1c3   :  { %v1074_v46 = vpop.eup %1073  ;;  %v797_v48 = vadd.f32 %v1062_v26, %v796_v44  ;;  %v645_v53 = vmul.f32 1.442695, %v624_v20  ;;  %1075 = vpow2.f32 %v655_v5 }
 0x1c4   :  { %v672_v28 = vmul.f32 %v1074_v46, %v1734_v16  ;;  %v816_v33 = vsub.f32 %v677_v8, %v1748_v6  ;;  %v810_v21 = vsub.f32 %v671_v35, %v1748_v6 }
 0x1c5   :  { %v801_v18 = vsel %vm800_vm2, %v1062_v26, %v797_v48  ;;  %1077 = vpow2.f32 %v645_v53 }
 0x1c6   :  { %v1782_v52 = vsel %vm803_vm3, %v805_v54, %v801_v18  ;;  %v603_v29 = vpop.f32.mrf.mxu2  ;;  %v811_v27 = vsub.f32 %v672_v28, %v1748_v6 }
 0x1c7   :  { %v823_v45 = vmul.f32 %v807_v62, %v1782_v52  ;;  %v829_v57 = vmul.f32 %v813_v11, %v1782_v52  ;;  %v836_v58 = vmul.f32 %v820_v49, %v1782_v52  ;;  %v824_v60 = vmul.f32 %v808_v38, %v1782_v52 }
 0x1c8   :  { %v830_v61 = vmul.f32 %v814_v39, %v1782_v52  ;;  %v837_v63 = vmul.f32 %v821_v50, %v1782_v52  ;;  %v825_v15 = vmul.f32 %v809_v55, %v1782_v52  ;;  %v831_v30 = vmul.f32 %v815_v12, %v1782_v52 }
 0x1c9   :  { %v839_v34 = vadd.f32 0.0001, %v823_v45  ;;  %v845_v7 = vadd.f32 0.0001, %v829_v57  ;;  %v852_v10 = vadd.f32 0.0001, %v836_v58  ;;  %v1076_v37 = vpop.eup %1075  ;;  %v838_v26 = vmul.f32 %v822_v0, %v1782_v52 }
 0x1ca   :  { %v840_v2 = vadd.f32 0.0001, %v824_v60  ;;  %v846_v42 = vadd.f32 0.0001, %v830_v61  ;;  %v853_v17 = vadd.f32 0.0001, %v837_v63  ;;  %v826_v9 = vmul.f32 %v810_v21, %v1782_v52 }
 0x1cb   :  { %v1078_v3 = vpop.eup %1077  ;;  %1079 = vtanh.f32 %v839_v34  ;;  %v841_v25 = vadd.f32 0.0001, %v825_v15  ;;  %v832_v13 = vmul.f32 %v816_v33, %v1782_v52  ;;  %v678_v14 = vmul.f32 %v1076_v37, %v1734_v16 }
 0x1cc   :  { %1081 = vtanh.f32 %v845_v7  ;;  %v673_v59 = vmul.f32 %v1078_v3, %v1734_v16  ;;  %v847_v22 = vadd.f32 0.0001, %v831_v30  ;;  %v827_v41 = vmul.f32 %v811_v27, %v1782_v52 }
 0x1cd   :  { %1083 = vtanh.f32 %v852_v10  ;;  %v854_v51 = vadd.f32 0.0001, %v838_v26  ;;  %v817_v62 = vsub.f32 %v678_v14, %v1748_v6  ;;  %v842_v31 = vadd.f32 0.0001, %v826_v9 }
 0x1ce   :  { %1085 = vtanh.f32 %v840_v2  ;;  %v812_v1 = vsub.f32 %v673_v59, %v1748_v6  ;;  %v606_v19 = vpop.f32.mrf.mxu2  ;;  %v630_v32 = vmul.f32 %v1731_v24, %v603_v29  ;;  %v848_v11 = vadd.f32 0.0001, %v832_v13 }
 0x1cf   :  { %1087 = vtanh.f32 %v846_v42  ;;  %v833_v47 = vmul.f32 %v817_v62, %v1782_v52  ;;  %v843_v44 = vadd.f32 0.0001, %v827_v41  ;;  %v631_v5 = vmul.f32 %v1731_v24, %v606_v19 }
 0x1d0   :  { %1089 = vtanh.f32 %v853_v17  ;;  %v828_v4 = vmul.f32 %v812_v1, %v1782_v52  ;;  %v657_v23 = vmul.f32 1.442695, %v630_v32 }
 0x1d1   :  { %v1080_v36 = vpop.eup %1079  ;;  %1091 = vtanh.f32 %v841_v25  ;;  %v849_v40 = vadd.f32 0.0001, %v833_v47  ;;  %v659_v48 = vmul.f32 1.442695, %v631_v5 }
 0x1d2   :  { %v1082_v43 = vpop.eup %1081  ;;  %871 = vst [vmem:[#allocation5] sm:$0xff] %v1080_v36  ;;  %1093 = vtanh.f32 %v847_v22  ;;  %v844_v38 = vadd.f32 0.0001, %v828_v4 }
 0x1d3   :  { %v1084_v20 = vpop.eup %1083  ;;  %877 = vst [vmem:[#allocation5 + $0x30] sm:$0xff] %v1082_v43  ;;  %1095 = vtanh.f32 %v854_v51 }
 0x1d4   :  { %v1086_v49 = vpop.eup %1085  ;;  %884 = vst [vmem:[#allocation5 + $0x68] sm:$0xff] %v1084_v20  ;;  %1097 = vtanh.f32 %v842_v31 }
 0x1d5   :  { %v1088_v39 = vpop.eup %1087  ;;  %872 = vst [vmem:[#allocation5 + $0x8] sm:$0xff] %v1086_v49  ;;  %1099 = vtanh.f32 %v848_v11 }
 0x1d6   :  { %v1090_v46 = vpop.eup %1089  ;;  %878 = vst [vmem:[#allocation5 + $0x38] sm:$0xff] %v1088_v39  ;;  %1101 = vtanh.f32 %v843_v44 }
 0x1d7   :  { %v1092_v50 = vpop.eup %1091  ;;  %885 = vst [vmem:[#allocation5 + $0x70] sm:$0xff] %v1090_v46  ;;  %1103 = vtanh.f32 %v849_v40 }
 0x1d8   :  { %v1094_v24 = vpop.eup %1093  ;;  %873 = vst [vmem:[#allocation5 + $0x10] sm:$0xff] %v1092_v50  ;;  %1105 = vtanh.f32 %v844_v38 }
 0x1d9   :  { %v1096_v53 = vpop.eup %1095  ;;  %879 = vst [vmem:[#allocation5 + $0x40] sm:$0xff] %v1094_v24  ;;  %1107 = vpow2.f32 %v657_v23 }
 0x1da   :  { %v1098_v54 = vpop.eup %1097  ;;  %886 = vst [vmem:[#allocation5 + $0x78] sm:$0xff] %v1096_v53  ;;  %1109 = vpow2.f32 %v659_v48 }
 0x1db   :  { %v1100_v55 = vpop.eup %1099  ;;  %874 = vst [vmem:[#allocation5 + $0x18] sm:$0xff] %v1098_v54 }
 0x1dc   :  { %v1102_v56 = vpop.eup %1101  ;;  %880 = vst [vmem:[#allocation5 + $0x48] sm:$0xff] %v1100_v55 }
 0x1dd   :  { %v1104_v18 = vpop.eup %1103  ;;  %875 = vst [vmem:[#allocation5 + $0x20] sm:$0xff] %v1102_v56 }
 0x1de   :  { %v1106_v8 = vpop.eup %1105  ;;  %881 = vst [vmem:[#allocation5 + $0x50] sm:$0xff] %v1104_v18 }
 0x1df   :  { %v1108_v12 = vpop.eup %1107  ;;  %876 = vst [vmem:[#allocation5 + $0x28] sm:$0xff] %v1106_v8 }
 0x1e0   :  { %v1110_v35 = vpop.eup %1109  ;;  %v679_v28 = vmul.f32 %v1108_v12, %v1734_v16 }
 0x1e1   :  { %v680_v29 = vmul.f32 %v1110_v35, %v1734_v16 }
 0x1e2   :  { %v818_v45 = vsub.f32 %v679_v28, %v1748_v6 }
 0x1e3   :  { %v819_v57 = vsub.f32 %v680_v29, %v1748_v6 }
 0x1e4   :  { %v834_v58 = vmul.f32 %v818_v45, %v1782_v52 }
 0x1e5   :  { %v835_v60 = vmul.f32 %v819_v57, %v1782_v52 }
 0x1e6   :  { %v850_v61 = vadd.f32 0.0001, %v834_v58 }
 0x1e7   :  { %v851_v63 = vadd.f32 0.0001, %v835_v60 }
 0x1e8   :  { %1111 = vtanh.f32 %v850_v61 }
 0x1e9   :  { %1113 = vtanh.f32 %v851_v63 }
 0x1ee   :  { %v1112_v15 = vpop.eup %1111 }
 0x1ef   :  { %v1114_v16 = vpop.eup %1113  ;;  %882 = vst [vmem:[#allocation5 + $0x58] sm:$0xff] %v1112_v15 }
 0x1f0   :  { %883 = vst [vmem:[#allocation5 + $0x60] sm:$0xff] %v1114_v16 }
 0x1f1   :  { %899 = dma.vmem_to_hbm [thread:$0]  %s892_s19, 2048, %s894_s22, [#allocation3], %s1225_s11, %s1225_s11, %s1226_s12  }
 0x1f2   :  { %1217 = dma.done.wait [#allocation3], 2048  }
 0x1f3   :  { %1218 = vsyncadd [#allocation3], 4294965248 }
 0x1f4   :  { %1219 = dma.done.wait [#allocation7], 4096  }
 0x1f5   :  { %1220 = vsyncadd [#allocation7], 4294963200 }
 0x1f6   :  { %938 = vsyncpa [#allocation3], 1 }
 0x1f7   :  { %939 = vsyncpa [#allocation7], 1 }
 0x1f8   :  { %940 = vsyncpa [#allocation4], 1 }

</bundles_post_ra>
